<compile_context>
chip_gen: v7x
topology: tpu7x:2x2x1
jax: 0.10.0
libtpu: 0.0.40
codegen_flags: <defaults>
</compile_context>

<pallas_src>
import functools
import math

import jax
import jax.numpy as jnp
from jax.experimental import pallas as pl
from jax.experimental.pallas import tpu as pltpu

SILU_SCALE = 1.0 / 0.6            # GemNet ScaledSiLU ("swish")
INV_SQRT_2 = 1.0 / math.sqrt(2.0)


def _scaled_silu(x):
    return x * jax.nn.sigmoid(x) * SILU_SCALE


# ------------- kernel 1: fused (dense_ba | mlp_rbf) matmul + hadamard + down_projection
def _edge_mlp_kernel(mr_ref, w_fused_ref, w_down_ref, out_ref, *, De):
    # one MXU pass: [m | rbf3] @ blockdiag(w_ba, w_rbf) = [m@w_ba | rbf3@w_rbf]
    fused = jnp.dot(mr_ref[...], w_fused_ref[...], preferred_element_type=jnp.float32)
    x_ba = _scaled_silu(fused[:, :De])          # dense_ba activation
    rbf_emb = fused[:, De:]                     # mlp_rbf (no activation), s_rbf folded in
    h = (x_ba * rbf_emb).astype(mr_ref.dtype)
    out_ref[...] = _scaled_silu(
        jnp.dot(h, w_down_ref[...], preferred_element_type=jnp.float32)
    ).astype(out_ref.dtype)


# ------------- kernel 2: EfficientInteractionBilinear (+scale_cbf_sum folded)
# -------------           fused with up_projection_ca / up_projection_ac
def _bilinear_up_kernel(rbfW1_ref, sph_ref, m2_ref, w_bil_ref, w_up_ref,
                        y_ref, tmp_ref, *, S, K, Dc, Dt):
    f32 = jnp.float32
    # lane-dense flat inputs; promote coefficients once
    sph = sph_ref[...].astype(f32)        # (BE, S*K)
    rbfw = rbfW1_ref[...].astype(f32)     # (BE, Dc*S)
    m2 = m2_ref[...]                      # (BE, K*Dt) bf16

    # stage 1 (VPU): neighbour sums over k — sum_k[s] = sum_k sph[:,s,k] * m2[:,k,:], f32
    m2_strips = [m2[:, k * Dt:(k + 1) * Dt].astype(f32) for k in range(K)]
    sum_ks = []
    for s in range(S):
        acc = sph[:, s * K:s * K + 1] * m2_strips[0]
        for k in range(1, K):
            acc = acc + sph[:, s * K + k:s * K + k + 1] * m2_strips[k]
        sum_ks.append(acc)                # S x (BE, Dt) f32

    # stage 2 (VPU): contract the spherical axis per cbf channel c; cast once when
    # writing the flat bf16 tmp scratch that feeds the single flattened bilinear matmul.
    for c in range(Dc):
        acc = rbfw[:, c * S:c * S + 1] * sum_ks[0]
        for s in range(1, S):
            acc = acc + rbfw[:, c * S + s:c * S + s + 1] * sum_ks[s]
        tmp_ref[:, c * Dt:(c + 1) * Dt] = acc.astype(tmp_ref.dtype)

    # stage 3 (MXU): one flattened bilinear matmul, K = Dc*Dt (s_cbf folded into w_bil)
    x = jnp.dot(tmp_ref[...], w_bil_ref[...], preferred_element_type=jnp.float32)

    # stage 4 (MXU): fused [up_projection_ca | up_projection_ac], N = 2*De lane-dense
    y = jnp.dot(x.astype(w_up_ref.dtype), w_up_ref[...], preferred_element_type=jnp.float32)
    y_ref[...] = _scaled_silu(y).astype(y_ref.dtype)


def triplet_interaction(params, m, rbf3, cbf3, id3_ragged_idx, id_swap, id3_ba, id3_ca,
                        *, block_edges=512, compute_dtype=jnp.bfloat16):
    rbf_W1, sph = cbf3
    E, De = m.shape
    Dr = rbf3.shape[1]
    _, Dc, S = rbf_W1.shape
    Kmax = sph.shape[2]
    Dt = params['w_down'].shape[1]
    U = params['w_bil'].shape[2]
    cd = compute_dtype

    n_blocks = -(-E // block_edges)
    Ep = n_blocks * block_edges
    pad = Ep - E
    if pad:   # zero-pad edge rows; independent rows, sliced off at the end
        m = jnp.pad(m, ((0, pad), (0, 0)))
        rbf3 = jnp.pad(rbf3, ((0, pad), (0, 0)))
        rbf_W1 = jnp.pad(rbf_W1, ((0, pad), (0, 0), (0, 0)))
        sph = jnp.pad(sph, ((0, pad), (0, 0), (0, 0)))

    # ---- host-side weight prep: fold ScalingFactor consts, fuse, flatten, cast to bf16
    w_fused = jnp.zeros((De + Dr, 2 * De), jnp.float32)
    w_fused = w_fused.at[:De, :De].set(params['w_ba'])
    w_fused = w_fused.at[De:, De:].set(params['w_rbf'] * params['s_rbf'][0])
    w_fused = w_fused.astype(cd)                                              # (De+Dr, 2De)
    w_down = params['w_down'].astype(cd)                                      # (De, Dt)
    w_bil = (jnp.transpose(params['w_bil'], (1, 0, 2)) * params['s_cbf'][0]   # (Dc, Dt, U)
             ).reshape(Dc * Dt, U).astype(cd)                                 # (Dc*Dt, U)
    w_up = jnp.concatenate([params['w_up_ca'], params['w_up_ac']], axis=1).astype(cd)  # (U, 2De)

    mr = jnp.concatenate([m, rbf3], axis=1).astype(cd)                        # (Ep, De+Dr)

    cp = pltpu.CompilerParams(dimension_semantics=("parallel",),
                              vmem_limit_bytes=32 * 1024 * 1024)
    grid = (n_blocks,)

    # --- kernel 1 -------------------------------------------------------------------
    x_ba = pl.pallas_call(
        functools.partial(_edge_mlp_kernel, De=De),
        out_shape=jax.ShapeDtypeStruct((Ep, Dt), cd),
        grid=grid,
        in_specs=[
            pl.BlockSpec((block_edges, De + Dr), lambda i: (i, 0)),
            pl.BlockSpec((De + Dr, 2 * De), lambda i: (0, 0)),
            pl.BlockSpec((De, Dt), lambda i: (0, 0)),
        ],
        out_specs=pl.BlockSpec((block_edges, Dt), lambda i: (i, 0)),
        compiler_params=cp,
    )(mr, w_fused, w_down)

    # glue: triplet gather + ragged scatter into the lane-dense (Ep, Kmax*Dt) matrix
    # (torch: m2[id3_ca, id3_ragged_idx] = x_ba[id3_ba]); pure indexing, kept in XLA.
    # TODO(synk): replace with in-kernel scalar-prefetch DMA gather (triplets sorted by
    # id3_ca) to remove the m2 HBM round trip at large edge counts.
    x_trip = x_ba[id3_ba]
    m2 = jnp.zeros((Ep, Kmax, Dt), cd).at[id3_ca, id3_ragged_idx].set(x_trip)
    m2_flat = m2.reshape(Ep, Kmax * Dt)

    rbfW1_flat = rbf_W1.reshape(Ep, Dc * S).astype(cd)
    sph_flat = sph.reshape(Ep, S * Kmax).astype(cd)

    # --- kernel 2 (bilinear + scale_cbf_sum + both up projections, fused) ------------
    y = pl.pallas_call(
        functools.partial(_bilinear_up_kernel, S=S, K=Kmax, Dc=Dc, Dt=Dt),
        out_shape=jax.ShapeDtypeStruct((Ep, 2 * De), cd),
        grid=grid,
        in_specs=[
            pl.BlockSpec((block_edges, Dc * S), lambda i: (i, 0)),
            pl.BlockSpec((block_edges, S * Kmax), lambda i: (i, 0)),
            pl.BlockSpec((block_edges, Kmax * Dt), lambda i: (i, 0)),
            pl.BlockSpec((Dc * Dt, U), lambda i: (0, 0)),
            pl.BlockSpec((U, 2 * De), lambda i: (0, 0)),
        ],
        out_specs=pl.BlockSpec((block_edges, 2 * De), lambda i: (i, 0)),
        scratch_shapes=[pltpu.VMEM((block_edges, Dc * Dt), cd)],
        compiler_params=cp,
    )(rbfW1_flat, sph_flat, m2_flat, w_bil, w_up)

    # epilogue (f32): split the fused output, edge-swap permutation, combine.
    y = y[:E].astype(jnp.float32)
    y_ca = y[:, :De]
    y_ac = y[:, De:]
    return (y_ca + y_ac[id_swap]) * INV_SQRT_2


def init_params(key, De, Dt, U, Dr, Dc):
    ks = jax.random.split(key, 6)

    def dense_w(k, fan_in, fan_out):
        return jax.random.normal(k, (fan_in, fan_out), jnp.float32) / math.sqrt(fan_in)

    return dict(
        w_ba=dense_w(ks[0], De, De),                                          # dense_ba
        w_rbf=dense_w(ks[1], Dr, De),                                         # mlp_rbf
        w_down=dense_w(ks[2], De, Dt),                                        # down_projection
        w_bil=jax.random.normal(ks[3], (Dt, Dc, U), jnp.float32) / math.sqrt(Dt * Dc),  # mlp_cbf
        w_up_ca=dense_w(ks[4], U, De),
        w_up_ac=dense_w(ks[5], U, De),
        # ScalingFactor parameters (scale_file=None -> 1.0); folded into weights on host.
        # TODO(synk): ScalingFactor "fitting" statistics mode is not implemented (inference only).
        s_rbf=jnp.ones((1,), jnp.float32),
        s_cbf=jnp.ones((1,), jnp.float32),
    )


def reference(params, m, rbf3, cbf3, id3_ragged_idx, id_swap, id3_ba, id3_ca,
              *, compute_dtype=jnp.float32):
    """Pure-JAX reference; compute_dtype selects matmul-operand precision so the bf16
    kernel path can be checked against a matched-precision reference."""
    rbf_W1, sph = cbf3
    cd = compute_dtype
    f32 = jnp.float32
    with jax.default_matmul_precision("highest"):
        w_ba = params['w_ba'].astype(cd)
        w_rbf = (params['w_rbf'] * params['s_rbf'][0]).astype(cd)
        w_down = params['w_down'].astype(cd)
        w_bil = (jnp.transpose(params['w_bil'], (1, 0, 2)) * params['s_cbf'][0]).astype(cd)  # (Dc,Dt,U)
        w_up_ca = params['w_up_ca'].astype(cd)
        w_up_ac = params['w_up_ac'].astype(cd)

        x_ba = _scaled_silu(jnp.dot(m.astype(cd), w_ba, preferred_element_type=f32))
        rbf_emb = jnp.dot(rbf3.astype(cd), w_rbf, preferred_element_type=f32)
        h = (x_ba * rbf_emb).astype(cd)
        x_ba = _scaled_silu(jnp.dot(h, w_down, preferred_element_type=f32)).astype(cd)

        x_trip = x_ba[id3_ba]
        E, Kmax = sph.shape[0], sph.shape[2]
        Dt = x_ba.shape[1]
        m2 = jnp.zeros((E, Kmax, Dt), cd).at[id3_ca, id3_ragged_idx].set(x_trip)

        # small contractions kept in f32 (matches the kernel's VPU path)
        sum_k = jnp.einsum('bsk,bkt->bst', sph.astype(cd).astype(f32), m2.astype(f32))
        tmp = jnp.einsum('bcs,bst->bct', rbf_W1.astype(cd).astype(f32), sum_k)
        x = jnp.einsum('bct,ctu->bu', tmp.astype(cd), w_bil,
                       preferred_element_type=f32).astype(cd)

        y_ca = _scaled_silu(jnp.dot(x, w_up_ca, preferred_element_type=f32)).astype(cd)
        y_ac = _scaled_silu(jnp.dot(x, w_up_ac, preferred_element_type=f32)).astype(cd)
        return (y_ca.astype(f32) + y_ac.astype(f32)[id_swap]) * INV_SQRT_2


if __name__ == "__main__":
    E = 200               # nEdges (not a multiple of block_edges -> exercises padding path)
    Kper = 4              # triplets per edge  (-> Kmax)
    T = E * Kper          # nTriplets
    De, Dt, U = 128, 64, 64      # emb_size_edge, emb_size_trip, emb_size_bilinear
    Dr, Dc, S = 16, 16, 8        # emb_size_rbf, emb_size_cbf, num_spherical

    key = jax.random.PRNGKey(0)
    keys = jax.random.split(key, 8)

    m = jax.random.normal(keys[0], (E, De), jnp.float32)
    rbf3 = jax.random.normal(keys[1], (E, Dr), jnp.float32)
    rbf_W1 = jax.random.normal(keys[2], (E, Dc, S), jnp.float32) / math.sqrt(S)
    sph = jax.random.normal(keys[3], (E, S, Kper), jnp.float32)
    cbf3 = (rbf_W1, sph)

    id3_ca = jnp.repeat(jnp.arange(E, dtype=jnp.int32), Kper)          # reduce target edge
    id3_ragged_idx = jnp.tile(jnp.arange(Kper, dtype=jnp.int32), E)    # position within group
    id3_ba = jax.random.randint(keys[4], (T,), 0, E, dtype=jnp.int32)  # source edge gather
    id_swap = jnp.arange(E, dtype=jnp.int32).reshape(E // 2, 2)[:, ::-1].reshape(-1)

    params = init_params(keys[5], De, Dt, U, Dr, Dc)

    # block_edges=128 at this toy size so the grid has >1 block (exercises index maps);
    # use the default 512 for realistic edge counts.
    out = triplet_interaction(params, m, rbf3, cbf3, id3_ragged_idx, id_swap,
                              id3_ba, id3_ca, block_edges=128,
                              compute_dtype=jnp.bfloat16)
    out = jax.block_until_ready(out)
    assert out.shape == (E, De) and out.dtype == jnp.float32

    # Matched-precision reference (same bf16 matmul operands, f32 accumulation / VPU path).
    ref_bf16 = reference(params, m, rbf3, cbf3, id3_ragged_idx, id_swap, id3_ba, id3_ca,
                         compute_dtype=jnp.bfloat16)
    err = float(jnp.max(jnp.abs(out - ref_bf16)))
    assert err < 5e-2, f"max abs err vs matched-precision reference: {err}"

    # Sanity check: bf16 matmul drift vs the full fp32 reference stays small.
    ref_f32 = reference(params, m, rbf3, cbf3, id3_ragged_idx, id_swap, id3_ba, id3_ca,
                        compute_dtype=jnp.float32)
    err32 = float(jnp.max(jnp.abs(out - ref_f32)))
    bound = 0.15 * (float(jnp.max(jnp.abs(ref_f32))) + 1.0)
    assert err32 < bound, f"bf16 drift {err32} exceeds bound {bound}"

    print("KERNEL_OK")
</pallas_src>

<mosaic_0001>
module attributes {stable_mosaic.version = 11 : i64} {
  func.func @_edge_mlp_kernel(%arg0: i32, %arg1: memref<128x144xbf16, #tpu.memory_space<vmem>>, %arg2: memref<144x256xbf16, #tpu.memory_space<vmem>>, %arg3: memref<128x64xbf16, #tpu.memory_space<vmem>>, %arg4: memref<128x64xbf16, #tpu.memory_space<vmem>>) attributes {dimension_semantics = [#tpu.dimension_semantics<parallel>], iteration_bounds = array<i64: 2>, scalar_prefetch = 0 : i64, scratch_operands = 0 : i64, tpu.core_type = #tpu.core_type<tc>, window_params = [{transform_indices = @transform_0, window_bounds = array<i64: 128, 144>}, {pipeline_mode = #tpu.pipeline_mode<synchronous>, transform_indices = @transform_1, window_bounds = array<i64: 144, 256>}, {pipeline_mode = #tpu.pipeline_mode<synchronous>, transform_indices = @transform_2, window_bounds = array<i64: 128, 64>}, {transform_indices = @transform_3, window_bounds = array<i64: 128, 64>}]} {
    %c0 = arith.constant 0 : index
    %c0_0 = arith.constant 0 : index
    %0 = vector.load %arg1[%c0, %c0_0] : memref<128x144xbf16, #tpu.memory_space<vmem>>, vector<128x144xbf16>
    %c0_1 = arith.constant 0 : index
    %c0_2 = arith.constant 0 : index
    %1 = vector.load %arg2[%c0_1, %c0_2] : memref<144x256xbf16, #tpu.memory_space<vmem>>, vector<144x256xbf16>
    %cst = arith.constant dense<0.000000e+00> : vector<128x256xf32>
    %2 = tpu.matmul %0, %1, %cst {dimension_numbers = #tpu.dot_dimension_numbers<[1], [0], [0], [1], [0, 0, 1, 1], [], []>} : vector<128x144xbf16>, vector<144x256xbf16>, vector<128x256xf32> -> vector<128x256xf32>
    %3 = vector.extract_strided_slice %2 {offsets = [0, 0], sizes = [128, 128], strides = [1, 1]} : vector<128x256xf32> to vector<128x128xf32>
    %4 = arith.negf %3 : vector<128x128xf32>
    %5 = math.exp %4 : vector<128x128xf32>
    %cst_3 = arith.constant 1.000000e+00 : f32
    %6 = vector.broadcast %cst_3 : f32 to vector<128x128xf32>
    %7 = arith.addf %6, %5 : vector<128x128xf32>
    %8 = arith.divf %6, %7 : vector<128x128xf32>
    %9 = arith.mulf %3, %8 : vector<128x128xf32>
    %cst_4 = arith.constant 1.66666663 : f32
    %10 = vector.broadcast %cst_4 : f32 to vector<128x128xf32>
    %11 = arith.mulf %9, %10 : vector<128x128xf32>
    %12 = vector.extract_strided_slice %2 {offsets = [0, 128], sizes = [128, 128], strides = [1, 1]} : vector<128x256xf32> to vector<128x128xf32>
    %13 = arith.mulf %11, %12 : vector<128x128xf32>
    %14 = arith.truncf %13 : vector<128x128xf32> to vector<128x128xbf16>
    %c0_5 = arith.constant 0 : index
    %c0_6 = arith.constant 0 : index
    %15 = vector.load %arg3[%c0_5, %c0_6] : memref<128x64xbf16, #tpu.memory_space<vmem>>, vector<128x64xbf16>
    %cst_7 = arith.constant dense<0.000000e+00> : vector<128x64xf32>
    %16 = tpu.matmul %14, %15, %cst_7 {dimension_numbers = #tpu.dot_dimension_numbers<[1], [0], [0], [1], [0, 0, 1, 1], [], []>} : vector<128x128xbf16>, vector<128x64xbf16>, vector<128x64xf32> -> vector<128x64xf32>
    %17 = arith.negf %16 : vector<128x64xf32>
    %18 = math.exp %17 : vector<128x64xf32>
    %cst_8 = arith.constant 1.000000e+00 : f32
    %19 = vector.broadcast %cst_8 : f32 to vector<128x64xf32>
    %20 = arith.addf %19, %18 : vector<128x64xf32>
    %21 = arith.divf %19, %20 : vector<128x64xf32>
    %22 = arith.mulf %16, %21 : vector<128x64xf32>
    %cst_9 = arith.constant 1.66666663 : f32
    %23 = vector.broadcast %cst_9 : f32 to vector<128x64xf32>
    %24 = arith.mulf %22, %23 : vector<128x64xf32>
    %25 = arith.truncf %24 : vector<128x64xf32> to vector<128x64xbf16>
    %c0_10 = arith.constant 0 : index
    %c0_11 = arith.constant 0 : index
    %26 = vector.load %arg4[%c0_10, %c0_11] : memref<128x64xbf16, #tpu.memory_space<vmem>>, vector<128x64xbf16>
    tpu.vector_store %arg4[%c0_10, %c0_11], %25 {strides = array<i32>} : memref<128x64xbf16, #tpu.memory_space<vmem>>, vector<128x64xbf16>,
    return
  }
  func.func @transform_0(%arg0: i32) -> (i32, i32) {
    %c0_i32 = arith.constant 0 : i32
    %c0_i32_0 = arith.constant 0 : i32
    return %arg0, %c0_i32 : i32, i32
  }
  func.func @transform_1(%arg0: i32) -> (i32, i32) {
    %c0_i32 = arith.constant 0 : i32
    %c0_i32_0 = arith.constant 0 : i32
    %c0_i32_1 = arith.constant 0 : i32
    return %c0_i32, %c0_i32_0 : i32, i32
  }
  func.func @transform_2(%arg0: i32) -> (i32, i32) {
    %c0_i32 = arith.constant 0 : i32
    %c0_i32_0 = arith.constant 0 : i32
    %c0_i32_1 = arith.constant 0 : i32
    return %c0_i32, %c0_i32_0 : i32, i32
  }
  func.func @transform_3(%arg0: i32) -> (i32, i32) {
    %c0_i32 = arith.constant 0 : i32
    %c0_i32_0 = arith.constant 0 : i32
    return %arg0, %c0_i32 : i32, i32
  }
}

</mosaic_0001>

<bundles_post_ra>
// kernel: tpu_custom_call.1
= control target key start
LH: loop header
LB: loop body
LE: loop exit
PB: predicated region body
PF: predicated region fallthrough
CT: control target
= control target key end

     0   :  { %s1488_s12 = smov 0   ;;  %s1755_s0 = inlined_call_operand.vmem [shape: bf16[256,144], index: 0, kind: input, shape index: {}]   ;;  %s1756_s1 = inlined_call_operand.vmem [shape: bf16[144,256], index: 1, kind: input, shape index: {}]   ;;  %s1757_s2 = inlined_call_operand.vmem [shape: bf16[128,64], index: 2, kind: input, shape index: {}]   ;;  %s1758_s3 = inlined_call_operand.vmem [shape: bf16[256,64], index: 3, kind: output, shape index: {}]  }
   0x1 LB: > { %s1090_s13 = sadd.s32 4294967295, %s1466_s12   ;;  %p1094_p0 = scmp.ge.s32.totalorder %s1466_s12, 1  ;;  %s1466_s12 = sphi %s1488_s12, %s13_s12  }
   0x2   : > { %p139_p1 = scmp.lt.s32.totalorder %s1466_s12, 3 }
   0x4   : > { %p140_p2 = pnand %p1094_p0, %p139_p1 }
   0x5   : > { %v1273_v0 = vld [vmem:[%s1756_s1 + $0x4] ss:$8 sps:$4 sm:$0xff] (!%p140_p2)   ;;  %s1095_s16 = sshll.u32 (!%p140_p2), %s1090_s13, 4  ;;  %v1275_v1 = vld [vmem:[%s1756_s1] ss:$8 sps:$4 sm:$0xff] (!%p140_p2)   ;;  %vm374_vm0 = vcmask (!%p140_p2), 130048  }
   0x6   : > { %143 = sbr.rel (%p140_p2) target bundleno = 597 (0x255), region = 32  ;;  %p165_p3 = scmp.lt.s32.totalorder (!%p140_p2), %s1095_s16, 31  ;;  %399 = vmatprep.subr.bf16.mxu0 (!%p140_p2), %v1273_v0  ;;  %v1276_v2 = vld [vmem:[%s1756_s1 + $0x14] ss:$8 sps:$4 sm:$0xff] (!%p140_p2)   ;;  %v1278_v3 = vld [vmem:[%s1756_s1 + $0x10] ss:$8 sps:$4 sm:$0xff] (!%p140_p2)  }
   0x7   : > { %400 = vmatpush1.bf16.msra.mxu0 (!%p140_p2), %v1275_v1  ;;  %v1279_v4 = vld [vmem:[%s1756_s1 + $0x24] ss:$8 sps:$4 sm:$0xff] (!%p140_p2)   ;;  %v1281_v5 = vld [vmem:[%s1756_s1 + $0x20] ss:$8 sps:$4 sm:$0xff] (!%p140_p2)   ;;  %v1282_v6 = vld [vmem:[%s1756_s1 + $0x34] ss:$8 sps:$4 sm:$0xff] (!%p140_p2)  }
   0x8   : > { %401 = vmatprep.subr.bf16.mxu0 (!%p140_p2), %v1276_v2  ;;  %v1284_v7 = vld [vmem:[%s1756_s1 + $0x30] ss:$8 sps:$4 sm:$0xff] (!%p140_p2)   ;;  %v1285_v8 = vld [vmem:[%s1756_s1 + $0x44] ss:$8 sps:$4 sm:$0xff] (!%p140_p2)   ;;  %v1287_v10 = vld [vmem:[%s1756_s1 + $0x40] ss:$8 sps:$4 sm:$0xff] (!%p140_p2)  }
   0x9   : > { %v1288_v11 = vld [vmem:[%s1756_s1 + $0x54] ss:$8 sps:$4 sm:$0xff] (!%p140_p2)   ;;  %v1290_v12 = vld [vmem:[%s1756_s1 + $0x50] ss:$8 sps:$4 sm:$0xff] (!%p140_p2)   ;;  %v1291_v13 = vld [vmem:[%s1756_s1 + $0x64] ss:$8 sps:$4 sm:$0xff] (!%p140_p2)  }
   0xa   : > { %v1293_v14 = vld [vmem:[%s1756_s1 + $0x60] ss:$8 sps:$4 sm:$0xff] (!%p140_p2)   ;;  %v1294_v15 = vld [vmem:[%s1756_s1 + $0x74] ss:$8 sps:$4 sm:$0xff] (!%p140_p2)   ;;  %v1296_v16 = vld [vmem:[%s1756_s1 + $0x70] ss:$8 sps:$4 sm:$0xff] (!%p140_p2)  }
   0xb   : > { %402 = vmatpush1.bf16.msra.mxu0 (!%p140_p2), %v1278_v3  ;;  %v1297_v17 = vld [vmem:[%s1756_s1 + $0x84] ss:$8 sps:$4 sm:$0xff] (!%p140_p2)   ;;  %v1299_v18 = vld [vmem:[%s1756_s1 + $0x80] ss:$8 sps:$4 sm:$0xff] (!%p140_p2)   ;;  %v1326_v36 = vld [vmem:[%s1757_s2 + $0x10] sm:$0xff] (!%p140_p2)   ;;  %vm1017_vm1 = vcmask (!%p140_p2), 519168  }
   0xc   : > { %403 = vmatprep.subr.bf16.mxu0 (!%p140_p2), %v1279_v4  ;;  %v1324_v34 = vld [vmem:[%s1757_s2] sm:$0xff] (!%p140_p2)   ;;  %v1325_v35 = vld [vmem:[%s1757_s2 + $0x8] sm:$0xff] (!%p140_p2)   ;;  %v1327_v37 = vld [vmem:[%s1757_s2 + $0x18] sm:$0xff] (!%p140_p2)  }
   0xd   : > { %s1760_s16 = smov (!%p165_p3, %s1095_s16), 31  ;;  %1233 = vmatprep.subr.bf16.mxu1 %v1324_v34  ;;  %v1328_v38 = vld [vmem:[%s1757_s2 + $0x20] sm:$0xff]   ;;  %v1329_v39 = vld [vmem:[%s1757_s2 + $0x28] sm:$0xff]   ;;  %v1330_v40 = vld [vmem:[%s1757_s2 + $0x30] sm:$0xff]  }
   0xe   : > { %s1200_s27 = sshll.u32 %s1760_s16, 3  ;;  %1234 = vmatpush3.bf16.msra.mxu1 %v1324_v34  ;;  %v1331_v41 = vld [vmem:[%s1757_s2 + $0x38] sm:$0xff]   ;;  %s1099_s21 = sshll.u32 %s1760_s16, 2 }
   0xf   : > { %s1523_s5 = scalar_lea.vmem %s1755_s0, %s1200_s27  ;;  %404 = vmatpush1.bf16.msra.mxu0 %v1281_v5  ;;  %1235 = vmatprep.subr.bf16.mxu1 %v1325_v35  ;;  %s1698_s24 = scalar_lea.vmem %s1758_s3, %s1099_s21 }
  0x10   : > { %405 = vmatprep.subr.bf16.mxu0 %v1282_v6  ;;  %v1302_v9 = vld [vmem:[%s1523_s5 + $0x4] ss:$8 sps:$4 sm:$0xff]   ;;  %v1300_v19 = vld [vmem:[%s1523_s5] ss:$8 sps:$4 sm:$0xff]   ;;  %v1303_v20 = vld [vmem:[%s1523_s5 + $0x14] ss:$8 sps:$4 sm:$0xff]  }
  0x11   : > { %1134 = vmatprep.mubr.msk.bf16.mxu0 %vm374_vm0, %v1302_v9  ;;  %v1305_v21 = vld [vmem:[%s1523_s5 + $0x10] ss:$8 sps:$4 sm:$0xff]   ;;  %v1306_v22 = vld [vmem:[%s1523_s5 + $0x24] ss:$8 sps:$4 sm:$0xff]   ;;  %v1308_v23 = vld [vmem:[%s1523_s5 + $0x20] ss:$8 sps:$4 sm:$0xff]  }
  0x12   : > { %v1309_v24 = vld [vmem:[%s1523_s5 + $0x34] ss:$8 sps:$4 sm:$0xff]   ;;  %v1311_v25 = vld [vmem:[%s1523_s5 + $0x30] ss:$8 sps:$4 sm:$0xff]   ;;  %v1312_v26 = vld [vmem:[%s1523_s5 + $0x44] ss:$8 sps:$4 sm:$0xff]   ;;  %1236 = vmatpush3.bf16.msra.mxu1 %v1325_v35 }
  0x13   : > { %406 = vmatpush1.bf16.msra.mxu0 %v1284_v7  ;;  %v1314_v27 = vld [vmem:[%s1523_s5 + $0x40] ss:$8 sps:$4 sm:$0xff]   ;;  %v1315_v28 = vld [vmem:[%s1523_s5 + $0x54] ss:$8 sps:$4 sm:$0xff]   ;;  %v1317_v29 = vld [vmem:[%s1523_s5 + $0x50] ss:$8 sps:$4 sm:$0xff]   ;;  %1237 = vmatprep.subr.bf16.mxu1 %v1326_v36 }
  0x14   : > { %407 = vmatprep.subr.bf16.mxu0 %v1285_v8  ;;  %v1318_v30 = vld [vmem:[%s1523_s5 + $0x64] ss:$8 sps:$4 sm:$0xff]   ;;  %v1320_v31 = vld [vmem:[%s1523_s5 + $0x60] ss:$8 sps:$4 sm:$0xff]   ;;  %v1321_v32 = vld [vmem:[%s1523_s5 + $0x74] ss:$8 sps:$4 sm:$0xff]  }
  0x15   : > { %v1323_v33 = vld [vmem:[%s1523_s5 + $0x70] ss:$8 sps:$4 sm:$0xff]  }
  0x16   : > { %1238 = vmatpush3.bf16.msra.mxu1 %v1326_v36 }
  0x17   : > { %408 = vmatpush1.bf16.msra.mxu0 %v1287_v10  ;;  %1239 = vmatprep.subr.bf16.mxu1 %v1327_v37 }
  0x18   : > { %409 = vmatprep.subr.bf16.mxu0 %v1288_v11 }
  0x1a   : > { %1240 = vmatpush3.bf16.msra.mxu1 %v1327_v37 }
  0x1b   : > { %410 = vmatpush1.bf16.msra.mxu0 %v1290_v12  ;;  %1241 = vmatprep.subr.bf16.mxu1 %v1328_v38 }
  0x1c   : > { %411 = vmatprep.subr.bf16.mxu0 %v1291_v13 }
  0x1e   : > { %1242 = vmatpush3.bf16.msra.mxu1 %v1328_v38 }
  0x1f   : > { %412 = vmatpush1.bf16.msra.mxu0 %v1293_v14  ;;  %1243 = vmatprep.subr.bf16.mxu1 %v1329_v39 }
  0x20   : > { %413 = vmatprep.subr.bf16.mxu0 %v1294_v15 }
  0x22   : > { %1244 = vmatpush3.bf16.msra.mxu1 %v1329_v39 }
  0x23   : > { %414 = vmatpush1.bf16.msra.mxu0 %v1296_v16  ;;  %1245 = vmatprep.subr.bf16.mxu1 %v1330_v40 }
  0x24   : > { %415 = vmatprep.subr.bf16.mxu0 %v1297_v17 }
  0x26   : > { %1246 = vmatpush3.bf16.msra.mxu1 %v1330_v40 }
  0x27   : > { %416 = vmatpush1.bf16.msra.mxu0 %v1299_v18  ;;  %1247 = vmatprep.subr.bf16.mxu1 %v1331_v41 }
  0x2a   : > { %432 = vmatmul.mubr.bf16.vlgmr.msra.gmra.mrb[0].mxu0 %v1300_v19  ;;  %1248 = vmatpush3.bf16.msra.mxu1 %v1331_v41 }
  0x2b   : > { %1135 = vmatprep.mubr.msk.bf16.mxu0 %vm374_vm0, %v1303_v20 }
  0x32   : > { %442 = vmatmul.mubr.bf16.gmra.mrb[4].mxu0 %v1305_v21 }
  0x33   : > { %1136 = vmatprep.mubr.msk.bf16.mxu0 %vm374_vm0, %v1306_v22 }
  0x3a   : > { %452 = vmatmul.mubr.bf16.gmra.mrb[8].mxu0 %v1308_v23 }
  0x3b   : > { %1137 = vmatprep.mubr.msk.bf16.mxu0 %vm374_vm0, %v1309_v24 }
  0x42   : > { %462 = vmatmul.mubr.bf16.gmra.mrb[12].mxu0 %v1311_v25 }
  0x43   : > { %1138 = vmatprep.mubr.msk.bf16.mxu0 %vm374_vm0, %v1312_v26 }
  0x4a   : > { %472 = vmatmul.mubr.bf16.gmra.mrb[16].mxu0 %v1314_v27 }
  0x4b   : > { %1139 = vmatprep.mubr.msk.bf16.mxu0 %vm374_vm0, %v1315_v28 }
  0x52   : > { %482 = vmatmul.mubr.bf16.gmra.mrb[20].mxu0 %v1317_v29 }
  0x53   : > { %1140 = vmatprep.mubr.msk.bf16.mxu0 %vm374_vm0, %v1318_v30 }
  0x5a   : > { %492 = vmatmul.mubr.bf16.gmra.mrb[24].mxu0 %v1320_v31 }
  0x5b   : > { %1141 = vmatprep.mubr.msk.bf16.mxu0 %vm374_vm0, %v1321_v32 }
  0x62   : > { %502 = vmatmul.mubr.bf16.gmra.mrb[28].mxu0 %v1323_v33 }
  0xfd   : > { %v433_v42 = vpop.f32.mrb[0].mxu0 }
  0xfe   : > { %v1142_v43 = vmul.f32 -1.442695, %v433_v42  ;;  %v435_v44 = vpop.f32.mrb[1].mxu0 }
  0xff   : > { %v437_v45 = vpop.f32.mrb[2].mxu0 }
 0x100   : > { %1332 = vpow2.f32 %v1142_v43  ;;  %v1143_v46 = vmul.f32 -1.442695, %v437_v45  ;;  %v439_v47 = vpop.f32.mrb[3].mxu0 }
 0x102   : > { %1334 = vpow2.f32 %v1143_v46 }
 0x105   : > { %v443_v48 = vpop.f32.mrb[4].mxu0 }
 0x106   : > { %v1144_v49 = vmul.f32 -1.442695, %v443_v48  ;;  %v1606_v50 = vpop.f32.mrb[5].mxu0 }
 0x107   : > { %v447_v51 = vpop.f32.mrb[6].mxu0 }
 0x108   : > { %1336 = vpow2.f32 %v1144_v49  ;;  %v1145_v52 = vmul.f32 -1.442695, %v447_v51  ;;  %v1608_v53 = vpop.f32.mrb[7].mxu0 }
 0x10a   : > { %v1333_v54 = vpop.eup %1332  ;;  %1338 = vpow2.f32 %v1145_v52 }
 0x10b   : > { %v560_v55 = vadd.f32 1.0, %v1333_v54 }
 0x10c   : > { %v1335_v56 = vpop.eup %1334 }
 0x10d   : > { %1340 = vrcp.f32 %v560_v55  ;;  %v561_v57 = vadd.f32 1.0, %v1335_v56  ;;  %v1610_v58 = vpop.f32.mrb[8].mxu0 }
 0x10e   : > { %v1146_v59 = vmul.f32 -1.442695, %v1610_v58  ;;  %v1613_v60 = vpop.f32.mrb[9].mxu0 }
 0x10f   : > { %1342 = vrcp.f32 %v561_v57  ;;  %v1615_v61 = vpop.f32.mrb[10].mxu0 }
 0x110   : > { %1344 = vpow2.f32 %v1146_v59  ;;  %v1147_v62 = vmul.f32 -1.442695, %v1615_v61  ;;  %v1618_v63 = vpop.f32.mrb[11].mxu0 }
 0x112   : > { %v1337_v0 = vpop.eup %1336  ;;  %1346 = vpow2.f32 %v1147_v62 }
 0x113   : > { %v562_v1 = vadd.f32 1.0, %v1337_v0 }
 0x114   : > { %v1339_v2 = vpop.eup %1338 }
 0x115   : > { %1348 = vrcp.f32 %v562_v1  ;;  %v563_v3 = vadd.f32 1.0, %v1339_v2  ;;  %v1620_v4 = vpop.f32.mrb[12].mxu0 }
 0x116   : > { %v1148_v5 = vmul.f32 -1.442695, %v1620_v4  ;;  %v1623_v6 = vpop.f32.mrb[13].mxu0 }
 0x117   : > { %v1341_v7 = vpop.eup %1340  ;;  %1350 = vrcp.f32 %v563_v3  ;;  %v1625_v8 = vpop.f32.mrb[14].mxu0 }
 0x118   : > { %v608_v9 = vmul.f32 %v1341_v7, %v433_v42  ;;  %1352 = vpow2.f32 %v1148_v5  ;;  %v1149_v10 = vmul.f32 -1.442695, %v1625_v8  ;;  %v1628_v11 = vpop.f32.mrb[15].mxu0 }
 0x119   : > { %v1343_v12 = vpop.eup %1342 }
 0x11a   : > { %v1345_v13 = vpop.eup %1344  ;;  %v624_v14 = vmul.f32 1.6666666, %v608_v9  ;;  %v609_v15 = vmul.f32 %v1343_v12, %v437_v45  ;;  %1354 = vpow2.f32 %v1149_v10 }
 0x11b   : > { %v564_v16 = vadd.f32 1.0, %v1345_v13 }
 0x11c   : > { %v1347_v17 = vpop.eup %1346  ;;  %v640_v18 = vmul.f32 %v624_v14, %v435_v44  ;;  %v625_v19 = vmul.f32 1.6666666, %v609_v15 }
 0x11d   : > { %1356 = vrcp.f32 %v564_v16  ;;  %v565_v20 = vadd.f32 1.0, %v1347_v17  ;;  %v1630_v21 = vpop.f32.mrb[16].mxu0 }
 0x11e   : > { %v641_v22 = vmul.f32 %v625_v19, %v439_v47  ;;  %v1150_v23 = vmul.f32 -1.442695, %v1630_v21  ;;  %v1633_v24 = vpop.f32.mrb[17].mxu0 }
 0x11f   : > { %v1349_v25 = vpop.eup %1348  ;;  %1358 = vrcp.f32 %v565_v20  ;;  %v1635_v26 = vpop.f32.mrb[18].mxu0 }
 0x120   : > { %v610_v27 = vmul.f32 %v1349_v25, %v443_v48  ;;  %1360 = vpow2.f32 %v1150_v23  ;;  %v1151_v28 = vmul.f32 -1.442695, %v1635_v26  ;;  %v1638_v29 = vpop.f32.mrb[19].mxu0  ;;  %v656_v30 = vpack.c.bf16 %v641_v22, %v640_v18 }
 0x121   : > { %v1351_v31 = vpop.eup %1350 }
 0x122   : > { %v1353_v32 = vpop.eup %1352  ;;  %v626_v33 = vmul.f32 1.6666666, %v610_v27  ;;  %v611_v34 = vmul.f32 %v1351_v31, %v447_v51  ;;  %1362 = vpow2.f32 %v1151_v28  ;;  %1249 = vmatprep.mubr.bf16.mxu1 %v656_v30 }
 0x123   : > { %v566_v35 = vadd.f32 1.0, %v1353_v32 }
 0x124   : > { %v1355_v36 = vpop.eup %1354  ;;  %v642_v37 = vmul.f32 %v626_v33, %v1606_v50  ;;  %v627_v38 = vmul.f32 1.6666666, %v611_v34 }
 0x125   : > { %1364 = vrcp.f32 %v566_v35  ;;  %v567_v39 = vadd.f32 1.0, %v1355_v36  ;;  %v1641_v40 = vpop.f32.mrb[20].mxu0 }
 0x126   : > { %v643_v41 = vmul.f32 %v627_v38, %v1608_v53  ;;  %v1152_v42 = vmul.f32 -1.442695, %v1641_v40  ;;  %v1645_v43 = vpop.f32.mrb[21].mxu0 }
 0x127   : > { %v1357_v44 = vpop.eup %1356  ;;  %1366 = vrcp.f32 %v567_v39  ;;  %v1647_v45 = vpop.f32.mrb[22].mxu0 }
 0x128   : > { %v657_v46 = vpack.c.bf16 %v643_v41, %v642_v37  ;;  %v612_v47 = vmul.f32 %v1357_v44, %v1610_v58  ;;  %1368 = vpow2.f32 %v1152_v42  ;;  %v1153_v48 = vmul.f32 -1.442695, %v1647_v45  ;;  %v1651_v49 = vpop.f32.mrb[23].mxu0 }
 0x129   : > { %v1359_v50 = vpop.eup %1358 }
 0x12a   : > { %v1361_v51 = vpop.eup %1360  ;;  %v628_v52 = vmul.f32 1.6666666, %v612_v47  ;;  %v613_v53 = vmul.f32 %v1359_v50, %v1615_v61  ;;  %1370 = vpow2.f32 %v1153_v48  ;;  %1250 = vmatmul.mubr.bf16.vlgmr.msra.gmra.mrb[0].mxu1 %v657_v46 }
 0x12b   : > { %v568_v54 = vadd.f32 1.0, %v1361_v51 }
 0x12c   : > { %v1363_v55 = vpop.eup %1362  ;;  %v644_v56 = vmul.f32 %v628_v52, %v1613_v60  ;;  %v629_v57 = vmul.f32 1.6666666, %v613_v53 }
 0x12d   : > { %1372 = vrcp.f32 %v568_v54  ;;  %v569_v59 = vadd.f32 1.0, %v1363_v55  ;;  %v1655_v58 = vpop.f32.mrb[24].mxu0 }
 0x12e   : > { %v645_v62 = vmul.f32 %v629_v57, %v1618_v63  ;;  %v1154_v0 = vmul.f32 -1.442695, %v1655_v58  ;;  %v1659_v1 = vpop.f32.mrb[25].mxu0 }
 0x12f   : > { %v1365_v2 = vpop.eup %1364  ;;  %1374 = vrcp.f32 %v569_v59  ;;  %v1661_v61 = vpop.f32.mrb[26].mxu0 }
 0x130   : > { %v658_v3 = vpack.c.bf16 %v645_v62, %v644_v56  ;;  %v614_v5 = vmul.f32 %v1365_v2, %v1620_v4  ;;  %1376 = vpow2.f32 %v1154_v0  ;;  %v1155_v60 = vmul.f32 -1.442695, %v1661_v61  ;;  %v1665_v7 = vpop.f32.mrb[27].mxu0 }
 0x131   : > { %v1367_v9 = vpop.eup %1366 }
 0x132   : > { %v1369_v10 = vpop.eup %1368  ;;  %v630_v12 = vmul.f32 1.6666666, %v614_v5  ;;  %v615_v63 = vmul.f32 %v1367_v9, %v1625_v8  ;;  %1378 = vpow2.f32 %v1155_v60  ;;  %1253 = vmatprep.mubr.bf16.mxu1 %v658_v3 }
 0x133   : > { %v570_v13 = vadd.f32 1.0, %v1369_v10 }
 0x134   : > { %v1371_v14 = vpop.eup %1370  ;;  %v646_v15 = vmul.f32 %v630_v12, %v1623_v6  ;;  %v631_v16 = vmul.f32 1.6666666, %v615_v63 }
 0x135   : > { %1380 = vrcp.f32 %v570_v13  ;;  %v571_v17 = vadd.f32 1.0, %v1371_v14  ;;  %v503_v4 = vpop.f32.mrb[28].mxu0 }
 0x136   : > { %v647_v18 = vmul.f32 %v631_v16, %v1628_v11  ;;  %v1156_v19 = vmul.f32 -1.442695, %v503_v4  ;;  %v505_v20 = vpop.f32.mrb[29].mxu0 }
 0x137   : > { %v1373_v22 = vpop.eup %1372  ;;  %1382 = vrcp.f32 %v571_v17  ;;  %v507_v23 = vpop.f32.mrb[30].mxu0 }
 0x138   : > { %v659_v25 = vpack.c.bf16 %v647_v18, %v646_v15  ;;  %v616_v8 = vmul.f32 %v1373_v22, %v1630_v21  ;;  %1384 = vpow2.f32 %v1156_v19  ;;  %v1157_v27 = vmul.f32 -1.442695, %v507_v23  ;;  %v509_v28 = vpop.f32.mrb[31].mxu0 }
 0x139   : > { %v1375_v30 = vpop.eup %1374 }
 0x13a   : > { %v1377_v31 = vpop.eup %1376  ;;  %v632_v6 = vmul.f32 1.6666666, %v616_v8  ;;  %v617_v32 = vmul.f32 %v1375_v30, %v1635_v26  ;;  %1386 = vpow2.f32 %v1157_v27  ;;  %1254 = vmatmul.mubr.bf16.gmra.mrb[4].mxu1 %v659_v25 }
 0x13b   : > { %v572_v33 = vadd.f32 1.0, %v1377_v31 }
 0x13c   : > { %v1379_v11 = vpop.eup %1378  ;;  %v648_v34 = vmul.f32 %v632_v6, %v1633_v24  ;;  %v633_v35 = vmul.f32 1.6666666, %v617_v32 }
 0x13d   : > { %1388 = vrcp.f32 %v572_v33  ;;  %v573_v36 = vadd.f32 1.0, %v1379_v11 }
 0x13e   : > { %v649_v37 = vmul.f32 %v633_v35, %v1638_v29 }
 0x13f   : > { %v1381_v21 = vpop.eup %1380  ;;  %1390 = vrcp.f32 %v573_v36 }
 0x140   : > { %v660_v38 = vpack.c.bf16 %v649_v37, %v648_v34  ;;  %v618_v39 = vmul.f32 %v1381_v21, %v1641_v40 }
 0x141   : > { %v1383_v41 = vpop.eup %1382 }
 0x142   : > { %v1385_v42 = vpop.eup %1384  ;;  %v634_v44 = vmul.f32 1.6666666, %v618_v39  ;;  %v619_v26 = vmul.f32 %v1383_v41, %v1647_v45  ;;  %1257 = vmatprep.mubr.bf16.mxu1 %v660_v38 }
 0x143   : > { %v574_v46 = vadd.f32 1.0, %v1385_v42 }
 0x144   : > { %v1387_v47 = vpop.eup %1386  ;;  %v650_v24 = vmul.f32 %v634_v44, %v1645_v43  ;;  %v635_v48 = vmul.f32 1.6666666, %v619_v26 }
 0x145   : > { %1392 = vrcp.f32 %v574_v46  ;;  %v575_v50 = vadd.f32 1.0, %v1387_v47 }
 0x146   : > { %v651_v29 = vmul.f32 %v635_v48, %v1651_v49 }
 0x147   : > { %v1389_v51 = vpop.eup %1388  ;;  %1394 = vrcp.f32 %v575_v50 }
 0x148   : > { %v661_v52 = vpack.c.bf16 %v651_v29, %v650_v24  ;;  %v620_v40 = vmul.f32 %v1389_v51, %v1655_v58 }
 0x149   : > { %v1391_v53 = vpop.eup %1390 }
 0x14a   : > { %v636_v54 = vmul.f32 1.6666666, %v620_v40  ;;  %v621_v55 = vmul.f32 %v1391_v53, %v1661_v61  ;;  %1258 = vmatmul.mubr.bf16.gmra.mrb[8].mxu1 %v661_v52 }
 0x14c   : > { %v652_v45 = vmul.f32 %v636_v54, %v1659_v1  ;;  %v637_v56 = vmul.f32 1.6666666, %v621_v55 }
 0x14e   : > { %v653_v43 = vmul.f32 %v637_v56, %v1665_v7 }
 0x14f   : > { %v1393_v57 = vpop.eup %1392 }
 0x150   : > { %v662_v59 = vpack.c.bf16 %v653_v43, %v652_v45  ;;  %v622_v62 = vmul.f32 %v1393_v57, %v503_v4 }
 0x151   : > { %v1395_v0 = vpop.eup %1394 }
 0x152   : > { %v638_v49 = vmul.f32 1.6666666, %v622_v62  ;;  %v623_v2 = vmul.f32 %v1395_v0, %v507_v23  ;;  %1261 = vmatprep.mubr.bf16.mxu1 %v662_v59 }
 0x154   : > { %v654_v3 = vmul.f32 %v638_v49, %v505_v20  ;;  %v639_v5 = vmul.f32 1.6666666, %v623_v2 }
 0x156   : > { %v655_v58 = vmul.f32 %v639_v5, %v509_v28 }
 0x158   : > { %v663_v60 = vpack.c.bf16 %v655_v58, %v654_v3 }
 0x15a   : > { %1262 = vmatmul.mubr.bf16.gmra.mrb[12].mxu1 %v663_v60 }
 0x1fd   : > { %v1251_v9 = vpop.f32.mrb[0].mxu1 }
 0x1fe   : > { %v1168_v61 = vmul.f32 -1.442695, %v1251_v9  ;;  %v762_v10 = vpop.f32.mrb[1].mxu1 }
 0x1ff   : > { %v1166_v12 = vmul.f32 -1.442695, %v762_v10  ;;  %v1252_v1 = vpop.f32.mrb[2].mxu1 }
 0x200   : > { %1396 = vpow2.f32 %v1168_v61  ;;  %v1169_v63 = vmul.f32 -1.442695, %v1252_v1  ;;  %v765_v7 = vpop.f32.mrb[3].mxu1 }
 0x201   : > { %1398 = vpow2.f32 %v1166_v12  ;;  %v1167_v13 = vmul.f32 -1.442695, %v765_v7 }
 0x202   : > { %1400 = vpow2.f32 %v1169_v63 }
 0x203   : > { %1402 = vpow2.f32 %v1167_v13 }
 0x20a   : > { %v1397_v14 = vpop.eup %1396 }
 0x20b   : > { %v1399_v15 = vpop.eup %1398  ;;  %v875_v16 = vadd.f32 1.0, %v1397_v14 }
 0x20c   : > { %v1401_v17 = vpop.eup %1400  ;;  %v873_v4 = vadd.f32 1.0, %v1399_v15 }
 0x20d   : > { %v1403_v18 = vpop.eup %1402  ;;  %1404 = vrcp.f32 %v875_v16  ;;  %v876_v19 = vadd.f32 1.0, %v1401_v17  ;;  %v1682_v20 = vpop.f32.mrb[4].mxu1 }
 0x20e   : > { %1406 = vrcp.f32 %v873_v4  ;;  %v874_v22 = vadd.f32 1.0, %v1403_v18  ;;  %v1172_v23 = vmul.f32 -1.442695, %v1682_v20  ;;  %v1685_v25 = vpop.f32.mrb[5].mxu1 }
 0x20f   : > { %1408 = vrcp.f32 %v876_v19  ;;  %v1170_v8 = vmul.f32 -1.442695, %v1685_v25  ;;  %v1688_v27 = vpop.f32.mrb[6].mxu1 }
 0x210   : > { %1410 = vrcp.f32 %v874_v22  ;;  %v1173_v28 = vmul.f32 -1.442695, %v1688_v27  ;;  %v1691_v30 = vpop.f32.mrb[7].mxu1 }
 0x211   : > { %1412 = vpow2.f32 %v1172_v23  ;;  %v1171_v31 = vmul.f32 -1.442695, %v1691_v30 }
 0x212   : > { %1414 = vpow2.f32 %v1170_v8 }
 0x213   : > { %1416 = vpow2.f32 %v1173_v28 }
 0x214   : > { %1418 = vpow2.f32 %v1171_v31 }
 0x217   : > { %v1405_v6 = vpop.eup %1404 }
 0x218   : > { %v1407_v32 = vpop.eup %1406  ;;  %v923_v33 = vmul.f32 %v1405_v6, %v1251_v9 }
 0x219   : > { %v1409_v11 = vpop.eup %1408  ;;  %v921_v34 = vmul.f32 %v1407_v32, %v762_v10 }
 0x21a   : > { %v1411_v35 = vpop.eup %1410  ;;  %v939_v36 = vmul.f32 1.6666666, %v923_v33  ;;  %v924_v37 = vmul.f32 %v1409_v11, %v1252_v1 }
 0x21b   : > { %v1413_v21 = vpop.eup %1412  ;;  %v937_v38 = vmul.f32 1.6666666, %v921_v34  ;;  %v922_v39 = vmul.f32 %v1411_v35, %v765_v7 }
 0x21c   : > { %v1415_v41 = vpop.eup %1414  ;;  %v1203_v42 = vpack.c.bf16 %v939_v36, %v939_v36  ;;  %v940_v44 = vmul.f32 1.6666666, %v924_v37  ;;  %v879_v26 = vadd.f32 1.0, %v1413_v21 }
 0x21d   : > { %v1417_v46 = vpop.eup %1416  ;;  %v1201_v47 = vpack.c.bf16 %v937_v38, %v937_v38  ;;  %v938_v24 = vmul.f32 1.6666666, %v922_v39  ;;  %v877_v48 = vadd.f32 1.0, %v1415_v41  ;;  %v1700_v50 = vpop.f32.mrb[8].mxu1 }
 0x21e   : > { %v1419_v29 = vpop.eup %1418  ;;  %1020 = vst.msk [vmem:[%s1698_s24 + $0x8] sm:$0xf] %vm1017_vm1, %v1203_v42  ;;  %v1204_v51 = vpack.c.bf16 %v940_v44, %v940_v44  ;;  %1420 = vrcp.f32 %v879_v26  ;;  %v880_v52 = vadd.f32 1.0, %v1417_v46  ;;  %v1176_v40 = vmul.f32 -1.442695, %v1700_v50  ;;  %v1705_v53 = vpop.f32.mrb[9].mxu1 }
 0x21f   : > { %1018 = vst.msk [vmem:[%s1698_s24] sm:$0xf] %vm1017_vm1, %v1201_v47  ;;  %v1202_v54 = vpack.c.bf16 %v938_v24, %v938_v24  ;;  %1422 = vrcp.f32 %v877_v48  ;;  %v878_v55 = vadd.f32 1.0, %v1419_v29  ;;  %v1174_v45 = vmul.f32 -1.442695, %v1705_v53  ;;  %v1710_v56 = vpop.f32.mrb[10].mxu1 }
 0x220   : > { %1021 = vst.msk [vmem:[%s1698_s24 + $0xc] sm:$0xf] %vm1017_vm1, %v1204_v51  ;;  %1424 = vrcp.f32 %v880_v52  ;;  %v1177_v43 = vmul.f32 -1.442695, %v1710_v56  ;;  %v797_v57 = vpop.f32.mrb[11].mxu1 }
 0x221   : > { %1019 = vst.msk [vmem:[%s1698_s24 + $0x4] sm:$0xf] %vm1017_vm1, %v1202_v54  ;;  %1426 = vrcp.f32 %v878_v55  ;;  %v1175_v59 = vmul.f32 -1.442695, %v797_v57 }
 0x222   : > { %1428 = vpow2.f32 %v1176_v40 }
 0x223   : > { %1430 = vpow2.f32 %v1174_v45 }
 0x224   : > { %1432 = vpow2.f32 %v1177_v43 }
 0x225   : > { %1434 = vpow2.f32 %v1175_v59 }
 0x228   : > { %v1421_v62 = vpop.eup %1420 }
 0x229   : > { %v1423_v0 = vpop.eup %1422  ;;  %v927_v49 = vmul.f32 %v1421_v62, %v1682_v20 }
 0x22a   : > { %v1425_v2 = vpop.eup %1424  ;;  %v925_v3 = vmul.f32 %v1423_v0, %v1685_v25 }
 0x22b   : > { %v1427_v5 = vpop.eup %1426  ;;  %v943_v58 = vmul.f32 1.6666666, %v927_v49  ;;  %v928_v60 = vmul.f32 %v1425_v2, %v1688_v27 }
 0x22c   : > { %v1429_v9 = vpop.eup %1428  ;;  %v941_v61 = vmul.f32 1.6666666, %v925_v3  ;;  %v926_v10 = vmul.f32 %v1427_v5, %v1691_v30 }
 0x22d   : > { %v1431_v12 = vpop.eup %1430  ;;  %v1207_v1 = vpack.c.bf16 %v943_v58, %v943_v58  ;;  %v944_v63 = vmul.f32 1.6666666, %v928_v60  ;;  %v883_v7 = vadd.f32 1.0, %v1429_v9  ;;  %v1721_v13 = vpop.f32.mrb[12].mxu1 }
 0x22e   : > { %v1433_v14 = vpop.eup %1432  ;;  %v1205_v15 = vpack.c.bf16 %v941_v61, %v941_v61  ;;  %v942_v16 = vmul.f32 1.6666666, %v926_v10  ;;  %v881_v17 = vadd.f32 1.0, %v1431_v12  ;;  %v810_v4 = vpop.f32.mrb[13].mxu1  ;;  %v1180_v22 = vmul.f32 -1.442695, %v1721_v13 }
 0x22f   : > { %v1435_v18 = vpop.eup %1434  ;;  %1024 = vst.msk [vmem:[%s1698_s24 + $0x18] sm:$0xf] %vm1017_vm1, %v1207_v1  ;;  %v1208_v19 = vpack.c.bf16 %v944_v63, %v944_v63  ;;  %1436 = vrcp.f32 %v883_v7  ;;  %v884_v20 = vadd.f32 1.0, %v1433_v14  ;;  %v1264_v23 = vpop.f32.mrb[14].mxu1  ;;  %v1178_v27 = vmul.f32 -1.442695, %v810_v4 }
 0x230   : > { %1022 = vst.msk [vmem:[%s1698_s24 + $0x10] sm:$0xf] %vm1017_vm1, %v1205_v15  ;;  %v1206_v25 = vpack.c.bf16 %v942_v16, %v942_v16  ;;  %1438 = vrcp.f32 %v881_v17  ;;  %v882_v8 = vadd.f32 1.0, %v1435_v18  ;;  %v813_v28 = vpop.f32.mrb[15].mxu1  ;;  %v1181_v30 = vmul.f32 -1.442695, %v1264_v23 }
 0x231   : > { %1025 = vst.msk [vmem:[%s1698_s24 + $0x1c] sm:$0xf] %vm1017_vm1, %v1208_v19  ;;  %1440 = vrcp.f32 %v884_v20  ;;  %v1179_v31 = vmul.f32 -1.442695, %v813_v28 }
 0x232   : > { %1023 = vst.msk [vmem:[%s1698_s24 + $0x14] sm:$0xf] %vm1017_vm1, %v1206_v25  ;;  %1442 = vrcp.f32 %v882_v8 }
 0x233   : > { %1444 = vpow2.f32 %v1180_v22 }
 0x234   : > { %1446 = vpow2.f32 %v1178_v27 }
 0x235   : > { %1448 = vpow2.f32 %v1181_v30 }
 0x236   : > { %1450 = vpow2.f32 %v1179_v31 }
 0x239   : > { %v1437_v6 = vpop.eup %1436 }
 0x23a   : > { %v1439_v32 = vpop.eup %1438  ;;  %v931_v33 = vmul.f32 %v1437_v6, %v1700_v50 }
 0x23b   : > { %v1441_v11 = vpop.eup %1440  ;;  %v929_v34 = vmul.f32 %v1439_v32, %v1705_v53 }
 0x23c   : > { %v1443_v35 = vpop.eup %1442  ;;  %v947_v36 = vmul.f32 1.6666666, %v931_v33  ;;  %v932_v37 = vmul.f32 %v1441_v11, %v1710_v56 }
 0x23d   : > { %v1445_v21 = vpop.eup %1444  ;;  %v945_v38 = vmul.f32 1.6666666, %v929_v34  ;;  %v930_v39 = vmul.f32 %v1443_v35, %v797_v57 }
 0x23e   : > { %v1447_v41 = vpop.eup %1446  ;;  %v1211_v42 = vpack.c.bf16 %v947_v36, %v947_v36  ;;  %v948_v44 = vmul.f32 1.6666666, %v932_v37  ;;  %v887_v26 = vadd.f32 1.0, %v1445_v21 }
 0x23f   : > { %v1449_v46 = vpop.eup %1448  ;;  %v1209_v47 = vpack.c.bf16 %v945_v38, %v945_v38  ;;  %v946_v24 = vmul.f32 1.6666666, %v930_v39  ;;  %v885_v48 = vadd.f32 1.0, %v1447_v41 }
 0x240   : > { %v1451_v50 = vpop.eup %1450  ;;  %1028 = vst.msk [vmem:[%s1698_s24 + $0x28] sm:$0xf] %vm1017_vm1, %v1211_v42  ;;  %v1212_v29 = vpack.c.bf16 %v948_v44, %v948_v44  ;;  %1452 = vrcp.f32 %v887_v26  ;;  %v888_v51 = vadd.f32 1.0, %v1449_v46 }
 0x241   : > { %1026 = vst.msk [vmem:[%s1698_s24 + $0x20] sm:$0xf] %vm1017_vm1, %v1209_v47  ;;  %v1210_v52 = vpack.c.bf16 %v946_v24, %v946_v24  ;;  %1454 = vrcp.f32 %v885_v48  ;;  %v886_v40 = vadd.f32 1.0, %v1451_v50 }
 0x242   : > { %1029 = vst.msk [vmem:[%s1698_s24 + $0x2c] sm:$0xf] %vm1017_vm1, %v1212_v29  ;;  %1456 = vrcp.f32 %v888_v51 }
 0x243   : > { %1027 = vst.msk [vmem:[%s1698_s24 + $0x24] sm:$0xf] %vm1017_vm1, %v1210_v52  ;;  %1458 = vrcp.f32 %v886_v40 }
 0x24a   : > { %v1453_v53 = vpop.eup %1452 }
 0x24b   : > { %v1455_v54 = vpop.eup %1454  ;;  %v935_v55 = vmul.f32 %v1453_v53, %v1721_v13 }
 0x24c   : > { %v1457_v45 = vpop.eup %1456  ;;  %v933_v56 = vmul.f32 %v1455_v54, %v810_v4 }
 0x24d   : > { %v1459_v43 = vpop.eup %1458  ;;  %v951_v57 = vmul.f32 1.6666666, %v935_v55  ;;  %v936_v59 = vmul.f32 %v1457_v45, %v1264_v23 }
 0x24e   : > { %v949_v62 = vmul.f32 1.6666666, %v933_v56  ;;  %v934_v0 = vmul.f32 %v1459_v43, %v813_v28 }
 0x24f   : > { %v1215_v49 = vpack.c.bf16 %v951_v57, %v951_v57  ;;  %v952_v2 = vmul.f32 1.6666666, %v936_v59 }
 0x250   : > { %v1213_v3 = vpack.c.bf16 %v949_v62, %v949_v62  ;;  %v950_v5 = vmul.f32 1.6666666, %v934_v0 }
 0x251   : > { %1032 = vst.msk [vmem:[%s1698_s24 + $0x38] sm:$0xf] %vm1017_vm1, %v1215_v49  ;;  %v1216_v58 = vpack.c.bf16 %v952_v2, %v952_v2 }
 0x252   : > { %1030 = vst.msk [vmem:[%s1698_s24 + $0x30] sm:$0xf] %vm1017_vm1, %v1213_v3  ;;  %v1214_v60 = vpack.c.bf16 %v950_v5, %v950_v5 }
 0x253   : > { %1033 = vst.msk [vmem:[%s1698_s24 + $0x3c] sm:$0xf] %vm1017_vm1, %v1216_v58 }
 0x254   : > { %1031 = vst.msk [vmem:[%s1698_s24 + $0x34] sm:$0xf] %vm1017_vm1, %v1214_v60 }
 0x255 PF: > { %s13_s12 = sadd.s32 1, %s1466_s12  }
 0x256   : > { %p10_p4 = scmp.ge.s32.totalorder %s13_s12, 4  }
 0x258   :  { %12 = sbr.rel (!%p10_p4) target bundleno = 1 (0x1), region = 62 }

</bundles_post_ra>
